<compile_context>
chip_gen: v6e
topology: v6e:2x2x1
jax: 0.10.0
libtpu: 0.0.40
codegen_flags: <defaults>
</compile_context>

<pallas_src>
import functools

import jax
import jax.numpy as jnp
from jax.experimental import pallas as pl
from jax.experimental.pallas import tpu as pltpu


_TM_CAP = 512            # sublane-dim tile cap
_TN_CAP = 1024           # lane-dim (output) tile cap
_VMEM_BUDGET = 32 << 20  # target double-buffered working-set bytes
_VMEM_LIMIT = 48 << 20   # scoped-VMEM limit (safe on v5e/v6e/v7x)


def _round_up(a: int, b: int) -> int:
    return (a + b - 1) // b * b


def _pick_tile(dim_padded: int, cap: int, step: int) -> int:
    """Largest multiple of `step` that is <= cap and divides `dim_padded`.

    `dim_padded` must itself be a multiple of `step`.  Choosing divisor tiles
    means padding (if any) is only up to the next `step` multiple, and aligned
    shapes need no padding / no output slice at all.
    """
    cap = max(step, min(cap, dim_padded))
    for cand in range(cap - cap % step, 0, -step):
        if dim_padded % cand == 0:
            return cand
    return step


def _linear_kernel_f32_out(x_ref, w_ref, b_ref, o_ref):
    """f32 output: accumulate directly into the resident output tile."""
    k = pl.program_id(2)
    p = jnp.dot(x_ref[...], w_ref[...], preferred_element_type=jnp.float32)

    @pl.when(k == 0)
    def _():
        # Initialize with dot + bias: no zero pass, no final bias add.
        o_ref[...] = p + b_ref[...].astype(jnp.float32)

    @pl.when(k != 0)
    def _():
        o_ref[...] += p


def _linear_kernel_lowp_out(x_ref, w_ref, b_ref, o_ref, acc_ref):
    """Low-precision output: f32 scratch accumulator, single cast at the end."""
    k = pl.program_id(2)
    p = jnp.dot(x_ref[...], w_ref[...], preferred_element_type=jnp.float32)

    @pl.when(k == 0)
    def _():
        acc_ref[...] = p + b_ref[...].astype(jnp.float32)

    @pl.when(k != 0)
    def _():
        acc_ref[...] += p

    @pl.when(k == pl.num_programs(2) - 1)
    def _():
        o_ref[...] = acc_ref[...].astype(o_ref.dtype)


@functools.partial(jax.jit, static_argnames=("tm", "tn", "tk", "out_dtype"))
def linear_pallas(x, weight, bias, *, tm=None, tn=None, tk=None, out_dtype=None):
    """y = x @ weight + bias via a tiled Pallas TPU matmul kernel."""
    M, K = x.shape
    K2, N = weight.shape
    assert K == K2, "weight shape mismatch"
    assert bias.shape == (N,), "bias shape mismatch"

    out_dtype = jnp.dtype(x.dtype if out_dtype is None else out_dtype)
    f32_out = out_dtype == jnp.dtype(jnp.float32)

    x_isz = jnp.dtype(x.dtype).itemsize
    w_isz = jnp.dtype(weight.dtype).itemsize
    o_isz = out_dtype.itemsize

    # Sublane packing: 8 rows for 4-byte dtypes, 16 for bf16, 32 for int8/fp8.
    sub = 8 * max(1, 4 // x_isz)

    Mp0 = _round_up(M, sub)
    Kp0 = _round_up(K, 128)
    Np0 = _round_up(N, 128)

    if tm is None:
        tm = _pick_tile(Mp0, _TM_CAP, sub)
    tn_auto = tn is None
    if tn_auto:
        tn = _pick_tile(Np0, _TN_CAP, 128)
    # v7x megacore: if the M axis has a single block, split N into >=2 blocks
    # so both TensorCores get work (harmless extra grid steps on v5e/v6e).
    if tn_auto and (Mp0 // tm) == 1 and tn == Np0 and Np0 >= 2 * 128:
        tn = _pick_tile(Np0, Np0 // 2, 128)
    if tk is None:
        # Grow tk to the largest divisor of padded-K that keeps the
        # double-buffered working set under budget; when all of K fits, the
        # reduction loop collapses to a single MXU pass per (i, j) tile.
        fixed = 2 * tm * tn * o_isz + (0 if f32_out else tm * tn * 4) + 2 * tn * 4
        per_k = 2 * tm * x_isz + 2 * tn * w_isz
        if _VMEM_BUDGET > fixed:
            tk_cap = max(128, ((_VMEM_BUDGET - fixed) // per_k) // 128 * 128)
        else:
            tk_cap = 128
        tk = _pick_tile(Kp0, tk_cap, 128)

    Mp = _round_up(M, tm)
    Kp = _round_up(K, tk)
    Np = _round_up(N, tn)

    # Pad only when a dim is not already tile-divisible.  With auto tiles this
    # pads at most to the next 128 / sublane multiple; aligned shapes skip the
    # pad (and the output slice below) entirely.
    if (Mp, Kp) != (M, K):
        x = jnp.pad(x, ((0, Mp - M), (0, Kp - K)))
    if (Kp, Np) != (K, N):
        weight = jnp.pad(weight, ((0, Kp - K), (0, Np - N)))
    bias2d = bias.reshape(1, N)
    if Np != N:
        bias2d = jnp.pad(bias2d, ((0, 0), (0, Np - N)))

    grid = (Mp // tm, Np // tn, Kp // tk)

    kernel = _linear_kernel_f32_out if f32_out else _linear_kernel_lowp_out
    scratch = [] if f32_out else [pltpu.VMEM((tm, tn), jnp.float32)]

    cost = pl.CostEstimate(
        flops=2 * Mp * Kp * Np,
        transcendentals=0,
        bytes_accessed=(Mp * Kp * x_isz + Kp * Np * w_isz
                        + Np * jnp.dtype(bias.dtype).itemsize + Mp * Np * o_isz),
    )

    out = pl.pallas_call(
        kernel,
        out_shape=jax.ShapeDtypeStruct((Mp, Np), out_dtype),
        grid_spec=pltpu.PrefetchScalarGridSpec(
            num_scalar_prefetch=0,
            grid=grid,
            in_specs=[
                pl.BlockSpec((tm, tk), lambda i, j, k: (i, k)),  # x tile
                pl.BlockSpec((tk, tn), lambda i, j, k: (k, j)),  # weight tile
                pl.BlockSpec((1, tn), lambda i, j, k: (0, j)),   # bias tile
            ],
            out_specs=pl.BlockSpec((tm, tn), lambda i, j, k: (i, j)),
            scratch_shapes=scratch,
        ),
        compiler_params=pltpu.CompilerParams(
            dimension_semantics=("parallel", "parallel", "arbitrary"),
            vmem_limit_bytes=_VMEM_LIMIT,
        ),
        cost_estimate=cost,
    )(x, weight, bias2d)

    if (Mp, Np) != (M, N):
        out = out[:M, :N]
    return out


if __name__ == "__main__":
    # Small shapes consistent with Linear(num_in, num_out).
    batch, num_in, num_out = 16, 128, 256

    key = jax.random.PRNGKey(0)
    kx, kw, kb = jax.random.split(key, 3)

    # Deterministic parameter init (uniform in +/- 1/sqrt(num_in), like nn.Linear).
    bound = 1.0 / (num_in ** 0.5)
    weight = jax.random.uniform(
        kw, (num_in, num_out), dtype=jnp.float32, minval=-bound, maxval=bound
    )
    bias = jax.random.uniform(
        kb, (num_out,), dtype=jnp.float32, minval=-bound, maxval=bound
    )
    x = jax.random.normal(kx, (batch, num_in), dtype=jnp.float32)

    out = jax.block_until_ready(linear_pallas(x, weight, bias))
    ref = x @ weight + bias[None, :]
    assert out.shape == (batch, num_out)
    assert jnp.allclose(out, ref, atol=1e-5, rtol=1e-5), "mismatch vs reference"

    # Second check: non-tile-divisible shapes exercise the (minimal) padding path.
    b2, k2_, n2 = 5, 100, 130
    kx2, kw2, kb2 = jax.random.split(jax.random.PRNGKey(1), 3)
    x2 = jax.random.normal(kx2, (b2, k2_), dtype=jnp.float32)
    w2 = jax.random.normal(kw2, (k2_, n2), dtype=jnp.float32) * 0.05
    bz2 = jax.random.normal(kb2, (n2,), dtype=jnp.float32) * 0.05
    out2 = jax.block_until_ready(linear_pallas(x2, w2, bz2))
    ref2 = x2 @ w2 + bz2[None, :]
    assert out2.shape == (b2, n2)
    assert jnp.allclose(out2, ref2, atol=1e-4, rtol=1e-4), "mismatch (padded case)"

    print("KERNEL_OK")
</pallas_src>

<mosaic_0001>
module attributes {stable_mosaic.version = 11 : i64} {
  func.func @_linear_kernel_f32_out(%arg0: i32, %arg1: i32, %arg2: i32, %arg3: memref<16x128xf32, #tpu.memory_space<vmem>>, %arg4: memref<128x128xf32, #tpu.memory_space<vmem>>, %arg5: memref<1x128xf32, #tpu.memory_space<vmem>>, %arg6: memref<16x128xf32, #tpu.memory_space<vmem>>) attributes {dimension_semantics = [#tpu.dimension_semantics<parallel>, #tpu.dimension_semantics<parallel>, #tpu.dimension_semantics<arbitrary>], iteration_bounds = array<i64: 1, 2, 1>, scalar_prefetch = 0 : i64, scratch_operands = 0 : i64, tpu.core_type = #tpu.core_type<tc>, window_params = [{transform_indices = @transform_0, window_bounds = array<i64: 16, 128>}, {transform_indices = @transform_1, window_bounds = array<i64: 128, 128>}, {transform_indices = @transform_2, window_bounds = array<i64: 1, 128>}, {transform_indices = @transform_3, window_bounds = array<i64: 16, 128>}]} {
    %c0 = arith.constant 0 : index
    %c0_0 = arith.constant 0 : index
    %0 = vector.load %arg3[%c0, %c0_0] : memref<16x128xf32, #tpu.memory_space<vmem>>, vector<16x128xf32>
    %c0_1 = arith.constant 0 : index
    %c0_2 = arith.constant 0 : index
    %1 = vector.load %arg4[%c0_1, %c0_2] : memref<128x128xf32, #tpu.memory_space<vmem>>, vector<128x128xf32>
    %cst = arith.constant dense<0.000000e+00> : vector<16x128xf32>
    %2 = tpu.matmul %0, %1, %cst {dimension_numbers = #tpu.dot_dimension_numbers<[1], [0], [0], [1], [0, 0, 1, 1], [], []>} : vector<16x128xf32>, vector<128x128xf32>, vector<16x128xf32> -> vector<16x128xf32>
    %c0_i32 = arith.constant 0 : i32
    %3 = arith.cmpi eq, %arg2, %c0_i32 : i32
    %4 = arith.extui %3 : i1 to i32
    %c0_i32_3 = arith.constant 0 : i32
    %5 = arith.cmpi ne, %4, %c0_i32_3 : i32
    scf.if %5 {
      %c0_6 = arith.constant 0 : index
      %c0_7 = arith.constant 0 : index
      %9 = vector.load %arg5[%c0_6, %c0_7] : memref<1x128xf32, #tpu.memory_space<vmem>>, vector<1x128xf32>
      %10 = vector.broadcast %9 : vector<1x128xf32> to vector<16x128xf32>
      %11 = arith.addf %2, %10 : vector<16x128xf32>
      %c0_8 = arith.constant 0 : index
      %c0_9 = arith.constant 0 : index
      %12 = vector.load %arg6[%c0_8, %c0_9] : memref<16x128xf32, #tpu.memory_space<vmem>>, vector<16x128xf32>
      tpu.vector_store %arg6[%c0_8, %c0_9], %11 {strides = array<i32>} : memref<16x128xf32, #tpu.memory_space<vmem>>, vector<16x128xf32>,
    } else {
    }
    %c0_i32_4 = arith.constant 0 : i32
    %6 = arith.cmpi ne, %arg2, %c0_i32_4 : i32
    %7 = arith.extui %6 : i1 to i32
    %c0_i32_5 = arith.constant 0 : i32
    %8 = arith.cmpi ne, %7, %c0_i32_5 : i32
    scf.if %8 {
      %c0_6 = arith.constant 0 : index
      %c0_7 = arith.constant 0 : index
      %9 = vector.load %arg6[%c0_6, %c0_7] : memref<16x128xf32, #tpu.memory_space<vmem>>, vector<16x128xf32>
      %10 = arith.addf %9, %2 : vector<16x128xf32>
      %c0_8 = arith.constant 0 : index
      %c0_9 = arith.constant 0 : index
      %11 = vector.load %arg6[%c0_8, %c0_9] : memref<16x128xf32, #tpu.memory_space<vmem>>, vector<16x128xf32>
      tpu.vector_store %arg6[%c0_8, %c0_9], %10 {strides = array<i32>} : memref<16x128xf32, #tpu.memory_space<vmem>>, vector<16x128xf32>,
    } else {
    }
    return
  }
  func.func @transform_0(%arg0: i32, %arg1: i32, %arg2: i32) -> (i32, i32) {
    %c0_i32 = arith.constant 0 : i32
    return %arg0, %arg2 : i32, i32
  }
  func.func @transform_1(%arg0: i32, %arg1: i32, %arg2: i32) -> (i32, i32) {
    %c0_i32 = arith.constant 0 : i32
    return %arg2, %arg1 : i32, i32
  }
  func.func @transform_2(%arg0: i32, %arg1: i32, %arg2: i32) -> (i32, i32) {
    %c0_i32 = arith.constant 0 : i32
    %c0_i32_0 = arith.constant 0 : i32
    return %c0_i32, %arg1 : i32, i32
  }
  func.func @transform_3(%arg0: i32, %arg1: i32, %arg2: i32) -> (i32, i32) {
    %c0_i32 = arith.constant 0 : i32
    return %arg0, %arg1 : i32, i32
  }
}

</mosaic_0001>

<bundles_post_ra>
// kernel: linear_pallas.1
= control target key start
LH: loop header
LB: loop body
LE: loop exit
PB: predicated region body
PF: predicated region fallthrough
CT: control target
= control target key end

     0   :  { %8 = vsyncpa [#allocation3], 0  ;;  %s1025_s0 = inlined_call_operand.hbm [shape: f32[16,128], index: 0, kind: input, shape index: {}]   ;;  %s1026_s1 = inlined_call_operand.hbm [shape: f32[128,256], index: 1, kind: input, shape index: {}]   ;;  %s1027_s2 = inlined_call_operand.vmem [shape: f32[1,256], index: 2, kind: input, shape index: {}]   ;;  %s1028_s3 = inlined_call_operand.hbm [shape: f32[16,256], index: 3, kind: output, shape index: {}]  }
   0x1   :  { %9 = vsyncpa [#allocation6], 0 }
   0x2   :  { %11 = vsyncpa [#allocation6 + $0x1], 0 }
   0x3   :  { %12 = vsyncpa [#allocation4], 0 }
   0x4   :  { %14 = vsyncpa [#allocation4 + $0x1], 0  ;;  %s821_s12 = smov 0   ;;  %s823_s13 = smov 0  }
   0x5   :  { %s825_s14 = smov 0   ;;  %s827_s15 = smov 0  }
   0x6   :  { %s829_s16 = smov 0   ;;  %s831_s17 = smov 0  }
   0x7 LB: > { %1035 = sst [smem:[#allocation11_spill]] %s790_s17  ;;  %s504_s18 = sadd.s32 4294967295, %s790_s17   ;;  %s790_s17 = sphi %s831_s17, %s20_s17   ;;  %s786_s16 = sphi %s829_s16, %s1056_s16   ;;  %s782_s15 = sphi %s827_s15, %s1055_s15   ;;  %s778_s14 = sphi %s825_s14, %s1054_s14   ;;  %s774_s13 = sphi %s823_s13, %s1053_s13   ;;  %s770_s12 = sphi %s821_s12, %s1052_s12  }
   0x8   : > { %s505_s19 = sadd.s32 4294967294, %s790_s17   ;;  %p83_p0 = scmp.ne.s32.totalorder %s778_s14, %s774_s13 }
   0x9   : > { %p84_p1 = scmp.eq.s32.totalorder %s790_s17, 0  ;;  %p89_p2 = scmp.ne.s32.totalorder %s774_s13, %s770_s12 }
   0xa   : > { %p858_p3 = scmp.eq.s32.totalorder %s504_s18, 0  ;;  %p141_p5 = scmp.eq.s32.totalorder %s504_s18, 1 }
   0xb   : > { %p862_p4 = por %p84_p1, %p83_p0  ;;  %p147_p7 = scmp.eq.s32.totalorder %s505_s19, 1 }
   0xc   : > { %p868_p6 = por %p858_p3, %p89_p2  ;;  %p872_p8 = por %p141_p5, %p83_p0 }
   0xd   : > { %p506_p9 = scmp.ge.s32.totalorder %s790_s17, 1  ;;  %p877_p10 = por %p147_p7, %p89_p2 }
   0xe   : > { %s1038_s22 = scalar_select %p868_p6, 1, 0 }
   0xf   : > { %s1039_s23 = scalar_select %p872_p8, 1, 0 }
  0x10   : > { %s1040_s24 = scalar_select %p877_p10, 1, 0 }
  0x11   : > { %p154_p11 = scmp.lt.s32.totalorder %s790_s17, 3  ;;  %s792_s26 = smov [#allocation2]  }
  0x12   : > { %1041 = sst [smem:[#allocation12_spill]] %s1040_s24  ;;  %s170_s27 = sshll.u32 %s792_s26, 4  ;;  %s171_s27 = int_to_ptr.vmem [resolvable:$true] %s170_s27 }
  0x13   : > { %p882_p12 = pnand %p506_p9, %p154_p11  ;;  %p594_p1 = scmp.lt.s32.totalorder %s790_s17, 2 }
  0x14   : > { %s35_s30 = sadd.s32 1, %s786_s16  ;;  %s663_s4 = scalar_lea.vmem %s171_s27, 256 }
  0x15   : > { %p581_p13 = pneg %p882_p12  ;;  %p898_p2 = pnand %p594_p1, %p862_p4 }
  0x16   : > { %p664_p9 = scmp.ne.s32.totalorder %s171_s27, %s663_s4  ;;  %p671_p0 = scmp.lt.s32.totalorder %s171_s27, %s171_s27 }
  0x17   : > { %p892_p5 = pnand %p581_p13, %p858_p3  ;;  %p672_p8 = scmp.lt.s32.totalorder %s663_s4, %s663_s4 }
  0x19   : > { %p654_p7 = pneg %p892_p5  ;;  %p673_p6 = por %p672_p8, %p671_p0 }
  0x1b   : > { %p666_p11 = pnand %p664_p9, %p654_p7 }
  0x1d   : > { %p667_p10 = pneg %p666_p11 }
  0x1f   : > { %p674_p13 = pnand %p673_p6, %p667_p10 }
  0x21   : > { %677 = shalt.err (!%p674_p13)
}
  0x22   : > { %s1034_s5 = smov 128   ;;  %s794_s6 = smov 8  }
  0x23   : > { %584 = dma.hbm_to_vmem [thread:$0]  (!%p892_p5), %s1025_s0, 256, %s171_s27, [#allocation3], %s1034_s5, %s1034_s5, %s794_s6  }
  0x24   : > { %p37_p4 = scmp.ge.s32.totalorder %s35_s30, 2  ;;  %s76_s9 = sadd.s32 1, %s778_s14 }
  0x25   : > { %s184_s10 = sand.u32 1, %s778_s14   ;;  %s510_s19 = sshll.u32 %s786_s16, 7 }
  0x26   : > { %s1058_s30 = smov (%p37_p4, %s35_s30), 0  ;;  %s509_s11 = sshll.u32 %s184_s10, 7 }
  0x27   : > { %s72_s18 = ssub.s32 %s786_s16, %s1058_s30  ;;  %s196_s28 = scalar_lea.hbm %s1026_s1, %s510_s19 }
  0x28   : > { %p74_p6 = scmp.eq.s32.totalorder %s72_s18, 0  ;;  %s188_s4 = scalar_lea.vmem [#allocation5], %s509_s11 }
  0x29   : > { %s197_s17 = sshll.u32 %s188_s4, 4  ;;  %s185_s27 = scalar_lea.sflag [#allocation6], %s184_s10  ;;  %s198_s17 = int_to_ptr.vmem [resolvable:$true] %s197_s17 }
  0x2a   : > { %s924_s24 = scalar_select %p74_p6, %s778_s14, %s76_s9  }
  0x2b   : > { %p680_p8 = pneg %p898_p2  ;;  %s691_s7 = scalar_lea.vmem %s198_s17, 2048 }
  0x2c   : > { %p692_p10 = scmp.ne.s32.totalorder %s198_s17, %s691_s7  ;;  %s795_s8 = smov [#allocation5]  }
  0x2d   : > { %s696_s5 = sshll.u32 %s795_s8, 4  ;;  %s697_s5 = int_to_ptr.vmem [resolvable:$false] %s696_s5 }
  0x2e   : > { %p694_p0 = pnand %p692_p10, %p680_p8  ;;  %s698_s18 = scalar_lea.vmem %s697_s5, 4096 }
  0x2f   : > { %p699_p5 = scmp.lt.s32.totalorder %s198_s17, %s697_s5  ;;  %p700_p7 = scmp.lt.s32.totalorder %s698_s18, %s691_s7 }
  0x30   : > { %p695_p1 = pneg %p694_p0 }
  0x31   : > { %p701_p9 = por %p700_p7, %p699_p5 }
  0x33   : > { %p702_p11 = pnand %p701_p9, %p695_p1 }
  0x35   : > { %705 = shalt.err (!%p702_p11)
}
  0x36   : > { %s796_s11 = smov 256   ;;  %s1045_s9 = smov 128  }
  0x37   : > { %588 = dma.hbm_to_vmem [thread:$0]  (!%p898_p2), %s196_s28, 2048, %s198_s17, %s185_s27, %s796_s11, %s1045_s9, %s794_s6  }
  0x38   : > { %215 = sbr.rel (%p882_p12) target bundleno = 311 (0x137), region = 32 }
  0x3d   : > { %757 = dma.done.wait (%p858_p3), [#allocation3], 256  }
  0x3e   : > { %759 = vsyncadd (%p858_p3), [#allocation3], 4294967040  ;;  %s939_s5 = sand.u32 1, %s774_s13   ;;  %p1046_p2 = scmp.ne.s32.totalorder %s1038_s22, 0 }
  0x3f   : > { %s513_s10 = sshll.u32 %s939_s5, 7  ;;  %s222_s29 = scalar_lea.sflag [#allocation6], %s939_s5 }
  0x40   : > { %s943_s19 = scalar_lea.vmem [#allocation5], %s513_s10 }
  0x41   : > { %761 = dma.done.wait (%p1046_p2), %s222_s29, 2048  }
  0x42   : > { %763 = vsyncadd (%p1046_p2), %s222_s29, 4294965248  ;;  %v274_v0 = vld [vmem:[%s943_s19 + $0x78] sm:$0xff]  ;;  %v273_v1 = vld [vmem:[%s943_s19 + $0x70] sm:$0xff]  ;;  %p253_p3 = scmp.lt.s32.totalorder %s782_s15, 1  ;;  %s514_s20 = sshll.u32 %s939_s5, 4 }
  0x43   : > { %538 = vmatprep.subr.mxu0 %v274_v0  ;;  %v272_v2 = vld [vmem:[%s943_s19 + $0x68] sm:$0xff]  ;;  %v271_v3 = vld [vmem:[%s943_s19 + $0x60] sm:$0xff]  ;;  %v257_v4 = vld [vmem:[#allocation2] sm:$0xff]  ;;  %s250_s21 = scalar_lea.vmem [#allocation7], %s514_s20  ;;  %s517_s28 = sshll.u32 %s782_s15, 7 }
  0x44   : > { %539 = vmatpush3.msra.mxu0 %v274_v0  ;;  %v270_v5 = vld [vmem:[%s943_s19 + $0x58] sm:$0xff]  ;;  %570 = vmatprep.mubr.f32.mxu0 %v257_v4  ;;  %v269_v6 = vld [vmem:[%s943_s19 + $0x50] sm:$0xff]  ;;  %v268_v7 = vld [vmem:[%s943_s19 + $0x48] sm:$0xff]  ;;  %s254_s17 = scalar_select %p253_p3, %s782_s15, 1 }
  0x45   : > { %540 = vmatprep.subr.mxu0 %v273_v1  ;;  %v267_v8 = vld [vmem:[%s943_s19 + $0x40] sm:$0xff]  ;;  %v266_v9 = vld [vmem:[%s943_s19 + $0x38] sm:$0xff]  ;;  %v265_v10 = vld [vmem:[%s943_s19 + $0x30] sm:$0xff]  ;;  %s391_s26 = sshll.u32 %s250_s21, 4  ;;  %s977_s7 = scalar_lea.hbm %s1028_s3, %s517_s28  ;;  %s972_s26 = int_to_ptr.vmem [resolvable:$true] %s391_s26 }
  0x46   : > { %541 = vmatpush3.msra.mxu0 %v273_v1  ;;  %v264_v11 = vld [vmem:[%s943_s19 + $0x28] sm:$0xff]  ;;  %v263_v12 = vld [vmem:[%s943_s19 + $0x20] sm:$0xff]  ;;  %v262_v13 = vld [vmem:[%s943_s19 + $0x18] sm:$0xff]  ;;  %s255_s6 = scalar_lea.vmem %s1027_s2, %s254_s17  ;;  %s376_s8 = scalar_lea.sflag [#allocation4], %s939_s5 }
  0x47   : > { %542 = vmatprep.subr.mxu0 %v272_v2  ;;  %v261_v14 = vld [vmem:[%s943_s19 + $0x10] sm:$0xff]  ;;  %v260_v15 = vld [vmem:[%s943_s19 + $0x8] sm:$0xff]  ;;  %v259_v16 = vld [vmem:[%s943_s19] sm:$0xff]  ;;  %s706_s18 = scalar_lea.vmem %s972_s26, 256  ;;  %p1047_p13 = scmp.ne.s32.totalorder %s1039_s23, 0 }
  0x48   : > { %543 = vmatpush3.msra.mxu0 %v272_v2  ;;  %v258_v17 = vld [vmem:[#allocation2 + $0x8] sm:$0xff]  ;;  %v515_v18 = vld [vmem:[%s255_s6] ss:$0 sm:$0xff]  ;;  %p707_p12 = scmp.ne.s32.totalorder %s972_s26, %s706_s18  ;;  %s797_s15 = smov [#allocation7]  }
  0x49   : > { %544 = vmatprep.subr.mxu0 %v271_v3  ;;  %s710_s11 = sshll.u32 %s797_s15, 4  ;;  %s711_s11 = int_to_ptr.vmem [resolvable:$false] %s710_s11 }
  0x4a   : > { %545 = vmatpush3.msra.mxu0 %v271_v3  ;;  %p708_p4 = pnand %p707_p12, %p1047_p13  ;;  %s712_s9 = scalar_lea.vmem %s711_s11, 512 }
  0x4b   : > { %546 = vmatprep.subr.mxu0 %v270_v5  ;;  %p713_p8 = scmp.lt.s32.totalorder %s972_s26, %s711_s11  ;;  %p714_p10 = scmp.lt.s32.totalorder %s712_s9, %s706_s18 }
  0x4c   : > { %547 = vmatpush3.msra.mxu0 %v270_v5  ;;  %p709_p6 = pneg %p708_p4 }
  0x4d   : > { %548 = vmatprep.subr.mxu0 %v269_v6  ;;  %p715_p0 = por %p714_p10, %p713_p8 }
  0x4e   : > { %549 = vmatpush3.msra.mxu0 %v269_v6 }
  0x4f   : > { %550 = vmatprep.subr.mxu0 %v268_v7  ;;  %p716_p1 = pnand %p715_p0, %p709_p6 }
  0x50   : > { %551 = vmatpush3.msra.mxu0 %v268_v7 }
  0x51   : > { %552 = vmatprep.subr.mxu0 %v267_v8 }
  0x52   : > { %553 = vmatpush3.msra.mxu0 %v267_v8 }
  0x53   : > { %554 = vmatprep.subr.mxu0 %v266_v9 }
  0x54   : > { %555 = vmatpush3.msra.mxu0 %v266_v9 }
  0x55   : > { %556 = vmatprep.subr.mxu0 %v265_v10 }
  0x56   : > { %557 = vmatpush3.msra.mxu0 %v265_v10 }
  0x57   : > { %558 = vmatprep.subr.mxu0 %v264_v11 }
  0x58   : > { %559 = vmatpush3.msra.mxu0 %v264_v11 }
  0x59   : > { %560 = vmatprep.subr.mxu0 %v263_v12 }
  0x5a   : > { %561 = vmatpush3.msra.mxu0 %v263_v12 }
  0x5b   : > { %562 = vmatprep.subr.mxu0 %v262_v13 }
  0x5c   : > { %563 = vmatpush3.msra.mxu0 %v262_v13 }
  0x5d   : > { %564 = vmatprep.subr.mxu0 %v261_v14 }
  0x5e   : > { %565 = vmatpush3.msra.mxu0 %v261_v14 }
  0x5f   : > { %566 = vmatprep.subr.mxu0 %v260_v15 }
  0x60   : > { %567 = vmatpush3.msra.mxu0 %v260_v15 }
  0x61   : > { %568 = vmatprep.subr.mxu0 %v259_v16 }
  0x62   : > { %569 = vmatpush3.msra.mxu0 %v259_v16 }
  0x63   : > { %571 = vmatmul.mubr.f32.vlgmr.msra.gmra.mxu0 %v258_v17 }
 0x123   : > { %v572_v19 = vpop.f32.mrf.mxu0 }
 0x124   : > { %v362_v20 = vadd.f32 %v572_v19, %v515_v18 }
 0x125   : > { %v341_v21 = vpop.f32.mrf.mxu0 }
 0x126   : > { %364 = vst [vmem:[%s250_s21 + $0x8] sm:$0xff] %v362_v20  ;;  %v361_v22 = vadd.f32 %v515_v18, %v341_v21 }
 0x128   : > { %363 = vst [vmem:[%s250_s21] sm:$0xff] %v361_v22 }
 0x129   : > { %719 = shalt.err (!%p716_p1)
}
 0x12a   : > { %s720_s10 = scalar_lea.hbm %s977_s7, 256  ;;  %s724_s17 = scalar_lea.hbm %s1028_s3, 512 }
 0x12b   : > { %p721_p5 = scmp.ne.s32.totalorder %s977_s7, %s720_s10  ;;  %p725_p11 = scmp.lt.s32.totalorder %s977_s7, %s1028_s3 }
 0x12c   : > { %p726_p2 = scmp.lt.s32.totalorder %s724_s17, %s720_s10 }
 0x12d   : > { %p722_p7 = pnand %p721_p5, %p1047_p13 }
 0x12e   : > { %p727_p3 = por %p726_p2, %p725_p11 }
 0x12f   : > { %p723_p9 = pneg %p722_p7 }
 0x131   : > { %p728_p12 = pnand %p727_p3, %p723_p9 }
 0x133   : > { %731 = shalt.err (!%p728_p12)
}
 0x134   : > { %s798_s25 = smov 128   ;;  %s799_s6 = smov 256  }
 0x135   : > { %s800_s21 = smov 8  }
 0x136   : > { %579 = dma.vmem_to_hbm [thread:$0]  (%p1047_p13), %s972_s26, 256, %s977_s7, %s376_s8, %s798_s25, %s799_s6, %s800_s21  }
 0x137 PF: > { %s1048_s28 = sld [smem:[#allocation12_spill]]  ;;  %s406_s27 = sand.u32 1, %s770_s12  }
 0x138   : > { %s1049_s4 = sld [smem:[#allocation11_spill]]  ;;  %s407_s18 = scalar_lea.sflag [#allocation4], %s406_s27 }
 0x13d   : > { %p1050_p4 = scmp.ne.s32.totalorder %s1048_s28, 0 }
 0x13e   : > { %p1051_p6 = scmp.ge.s32.totalorder %s1049_s4, 2 }
 0x140   : > { %p590_p8 = pnand %p1051_p6, %p1050_p4 }
 0x142   : > { %p591_p10 = pneg %p590_p8 }
 0x144   : > { %765 = dma.done.wait (%p591_p10), %s407_s18, 256  }
 0x145   : > { %767 = vsyncadd (%p591_p10), %s407_s18, 4294967040  ;;  %s20_s17 = sadd.s32 1, %s1049_s4   ;;  %s1052_s12 = smov %s774_s13 }
 0x146   : > { %p17_p0 = scmp.ge.s32.totalorder %s20_s17, 4   ;;  %s1053_s13 = smov %s778_s14 }
 0x147   : > { %s1054_s14 = smov %s924_s24  ;;  %s1055_s15 = smov %s786_s16 }
 0x148   : > { %s1056_s16 = smov %s1058_s30  ;;  %19 = sbr.rel (!%p17_p0) target bundleno = 7 (0x7), region = 94 }
 0x14d   :  { %412 = vsyncpa [#allocation3], 1 }
 0x14e   :  { %414 = vsyncpa [#allocation3 + $0x1], 1 }
 0x14f   :  { %415 = vsyncpa [#allocation6], 1 }
 0x150   :  { %417 = vsyncpa [#allocation6 + $0x1], 1 }
 0x151   :  { %418 = vsyncpa [#allocation4], 1 }
 0x152   :  { %420 = vsyncpa [#allocation4 + $0x1], 1 }

</bundles_post_ra>
